<compile_context>
chip_gen: v6e
topology: v6e:2x2x1
jax: 0.10.0
libtpu: 0.0.40
codegen_flags: <defaults>
</compile_context>

<pallas_src>
import functools

import jax
import jax.numpy as jnp
from jax.experimental import pallas as pl
from jax.experimental.pallas import tpu as pltpu


def _round_up(x: int, m: int) -> int:
    return ((x + m - 1) // m) * m


def _make_segment2_kernel(num_heads: int, pp: int, pp_pad: int):
    """pp = out_dim*out_dim, pp_pad = pp rounded up to a multiple of 128."""

    def kernel(x_ref, w_ref, b_ref, o_ref):
        # MXU: (TB, in_dim) @ (in_dim, num_heads*pp_pad), f32 accumulate.
        z = jnp.dot(x_ref[...], w_ref[...], preferred_element_type=jnp.float32)
        z = z + b_ref[...]  # (1, num_heads*pp_pad) broadcasts over TB rows.

        # relu per head, sum over heads.  Slices start on 128-lane boundaries
        # (pp_pad % 128 == 0) -> full-vreg VALU ops, no cross-lane shuffles.
        # The 1/num_heads mean scale is already folded into W/b.
        acc = jnp.maximum(z[:, 0:pp_pad], 0.0)
        for h in range(1, num_heads):
            acc = acc + jnp.maximum(z[:, h * pp_pad:(h + 1) * pp_pad], 0.0)

        # Store only the useful pp lanes; the output HBM array stays compact.
        o_ref[...] = acc[:, :pp].astype(o_ref.dtype)

    return kernel


def prepare_segment2_params(W, b, *, out_dim: int, num_heads: int,
                            matmul_dtype=jnp.float32):
    """One-time parameter prep (hoist out of the per-forward hot path).

    W : (out_features, in_dim)  PyTorch nn.Linear layout
    b : (out_features,)
    Returns (W_r, b_r, pp_pad) where
      W_r : (in_dim, num_heads*pp_pad)  head-grouped, 128-lane padded, *1/H
      b_r : (1, num_heads*pp_pad)       same permutation/padding, *1/H, f32
    """
    out_features, in_dim = W.shape
    pp = out_dim * out_dim
    assert out_features == pp * num_heads
    assert b.shape == (out_features,)
    pp_pad = _round_up(pp, 128)
    scale = 1.0 / num_heads

    # PyTorch: FC(x).reshape(-1, pp, num_heads) => output column c = p*H + h.
    # Regroup columns by head ([h, p]), pad p -> pp_pad, fold the mean scale.
    W_r = (W.T * scale).reshape(in_dim, pp, num_heads)          # (in, p, h)
    W_r = jnp.transpose(W_r, (0, 2, 1))                         # (in, h, p)
    W_r = jnp.pad(W_r, ((0, 0), (0, 0), (0, pp_pad - pp)))      # zero cols
    W_r = W_r.reshape(in_dim, num_heads * pp_pad).astype(matmul_dtype)

    b_r = (b * scale).reshape(pp, num_heads).T                  # (h, p)
    b_r = jnp.pad(b_r, ((0, 0), (0, pp_pad - pp)))
    b_r = b_r.reshape(1, num_heads * pp_pad).astype(jnp.float32)
    return W_r, b_r, pp_pad


@functools.partial(jax.jit, static_argnames=(
    "out_dim", "num_heads", "pp_pad", "block_b", "matmul_dtype"))
def segment2_forward(x, W_r, b_r, *, out_dim: int, num_heads: int,
                     pp_pad: int, block_b: int = 512,
                     matmul_dtype=jnp.float32):
    """
    x   : (B, in_dim) float32
    W_r : (in_dim, num_heads*pp_pad)  from prepare_segment2_params
    b_r : (1, num_heads*pp_pad)
    returns (B, out_dim, out_dim) float32
    """
    B, in_dim = x.shape
    pp = out_dim * out_dim
    nf_pad = num_heads * pp_pad
    assert W_r.shape == (in_dim, nf_pad)
    assert b_r.shape == (1, nf_pad)

    # Batch tile: multiple of 8 sublanes, capped at block_b.
    TB = min(_round_up(block_b, 8), _round_up(B, 8))
    B_pad = _round_up(B, TB)
    if B_pad != B:
        x = jnp.pad(x, ((0, B_pad - B), (0, 0)))
    x = x.astype(matmul_dtype)
    grid = (B_pad // TB,)

    # VMEM budget: resident W/b + double-buffered x/out tiles + z live.
    itemsize_in = jnp.dtype(matmul_dtype).itemsize
    est = (W_r.size * itemsize_in + b_r.size * 4
           + 2 * (TB * in_dim * itemsize_in + TB * pp * 4)
           + TB * nf_pad * 4)
    vmem_limit = int(min(max(2 * est, 16 * 1024 * 1024), 64 * 1024 * 1024))

    cost = pl.CostEstimate(
        flops=2 * B_pad * in_dim * nf_pad,
        transcendentals=0,
        bytes_accessed=int(B_pad * in_dim * itemsize_in
                           + W_r.size * itemsize_in
                           + b_r.size * 4
                           + B_pad * pp * 4),
    )

    kernel = _make_segment2_kernel(num_heads, pp, pp_pad)

    out2d = pl.pallas_call(
        kernel,
        out_shape=jax.ShapeDtypeStruct((B_pad, pp), jnp.float32),
        grid_spec=pltpu.PrefetchScalarGridSpec(
            num_scalar_prefetch=0,
            grid=grid,
            in_specs=[
                pl.BlockSpec((TB, in_dim), lambda i: (i, 0)),      # streamed
                pl.BlockSpec((in_dim, nf_pad), lambda i: (0, 0)),  # resident
                pl.BlockSpec((1, nf_pad), lambda i: (0, 0)),       # resident
            ],
            out_specs=pl.BlockSpec((TB, pp), lambda i: (i, 0)),
        ),
        compiler_params=pltpu.CompilerParams(
            dimension_semantics=("parallel",),   # shard batch tiles on v7x's 2 TCs
            vmem_limit_bytes=vmem_limit,
        ),
        cost_estimate=cost,
    )(x, W_r, b_r)

    # Drop batch padding (no-op when B_pad == B); reshape is layout-free.
    if B_pad != B:
        out2d = out2d[:B]
    return out2d.reshape(B, out_dim, out_dim)


def _reference(x, W, b, *, out_dim, num_heads):
    """Pure-JAX replica of the PyTorch forward for validation."""
    pp = out_dim * out_dim
    fc = x @ W.T + b                                   # (B, pp*num_heads)
    fc = jax.nn.relu(fc.reshape(-1, pp, num_heads))    # relu commutes w/ reshape
    return jnp.mean(fc, axis=-1).reshape(-1, out_dim, out_dim)


if __name__ == "__main__":
    in_dim = 32
    out_dim = 8
    num_heads = 4
    out_features = out_dim * out_dim * num_heads  # 256

    key = jax.random.PRNGKey(0)
    kx, kw, kb, kx2 = jax.random.split(key, 4)

    # nn.Linear-shaped synthetic params: W (out, in), b (out,)
    bound = 1.0 / (in_dim ** 0.5)
    W = jax.random.uniform(kw, (out_features, in_dim), jnp.float32, -bound, bound)
    b = jax.random.uniform(kb, (out_features,), jnp.float32, -bound, bound)

    # One-time parameter prep (outside the hot path).
    W_r, b_r, pp_pad = prepare_segment2_params(
        W, b, out_dim=out_dim, num_heads=num_heads, matmul_dtype=jnp.float32)

    # --- small test: B=2 (single grid step, padded batch tile) ---
    B = 2
    x = jax.random.normal(kx, (B, in_dim), dtype=jnp.float32)
    out = segment2_forward(x, W_r, b_r, out_dim=out_dim, num_heads=num_heads,
                           pp_pad=pp_pad, block_b=512)
    out = jax.block_until_ready(out)
    ref = _reference(x, W, b, out_dim=out_dim, num_heads=num_heads)
    assert out.shape == (B, out_dim, out_dim)
    assert jnp.allclose(out, ref, atol=1e-5, rtol=1e-5)

    # --- tiled test: B not divisible by the tile, multiple grid steps ---
    B2 = 300
    x2 = jax.random.normal(kx2, (B2, in_dim), dtype=jnp.float32)
    out2 = segment2_forward(x2, W_r, b_r, out_dim=out_dim, num_heads=num_heads,
                            pp_pad=pp_pad, block_b=128)
    out2 = jax.block_until_ready(out2)
    ref2 = _reference(x2, W, b, out_dim=out_dim, num_heads=num_heads)
    assert out2.shape == (B2, out_dim, out_dim)
    assert jnp.allclose(out2, ref2, atol=1e-5, rtol=1e-5)

    print("KERNEL_OK")
</pallas_src>

<mosaic_0001>
module attributes {stable_mosaic.version = 11 : i64} {
  func.func @kernel(%arg0: i32, %arg1: memref<8x32xf32, #tpu.memory_space<vmem>>, %arg2: memref<32x512xf32, #tpu.memory_space<vmem>>, %arg3: memref<1x512xf32, #tpu.memory_space<vmem>>, %arg4: memref<8x64xf32, #tpu.memory_space<vmem>>) attributes {dimension_semantics = [#tpu.dimension_semantics<parallel>], iteration_bounds = array<i64: 1>, scalar_prefetch = 0 : i64, scratch_operands = 0 : i64, tpu.core_type = #tpu.core_type<tc>, window_params = [{transform_indices = @transform_0, window_bounds = array<i64: 8, 32>}, {pipeline_mode = #tpu.pipeline_mode<synchronous>, transform_indices = @transform_1, window_bounds = array<i64: 32, 512>}, {pipeline_mode = #tpu.pipeline_mode<synchronous>, transform_indices = @transform_2, window_bounds = array<i64: 1, 512>}, {transform_indices = @transform_3, window_bounds = array<i64: 8, 64>}]} {
    %c0 = arith.constant 0 : index
    %c0_0 = arith.constant 0 : index
    %0 = vector.load %arg1[%c0, %c0_0] : memref<8x32xf32, #tpu.memory_space<vmem>>, vector<8x32xf32>
    %c0_1 = arith.constant 0 : index
    %c0_2 = arith.constant 0 : index
    %1 = vector.load %arg2[%c0_1, %c0_2] : memref<32x512xf32, #tpu.memory_space<vmem>>, vector<32x512xf32>
    %cst = arith.constant dense<0.000000e+00> : vector<8x512xf32>
    %2 = tpu.matmul %0, %1, %cst {dimension_numbers = #tpu.dot_dimension_numbers<[1], [0], [0], [1], [0, 0, 1, 1], [], []>} : vector<8x32xf32>, vector<32x512xf32>, vector<8x512xf32> -> vector<8x512xf32>
    %c0_3 = arith.constant 0 : index
    %c0_4 = arith.constant 0 : index
    %3 = vector.load %arg3[%c0_3, %c0_4] : memref<1x512xf32, #tpu.memory_space<vmem>>, vector<1x512xf32>
    %4 = vector.broadcast %3 : vector<1x512xf32> to vector<8x512xf32>
    %5 = arith.addf %2, %4 : vector<8x512xf32>
    %6 = vector.extract_strided_slice %5 {offsets = [0, 0], sizes = [8, 128], strides = [1, 1]} : vector<8x512xf32> to vector<8x128xf32>
    %cst_5 = arith.constant 0.000000e+00 : f32
    %7 = vector.broadcast %cst_5 : f32 to vector<8x128xf32>
    %8 = arith.maximumf %6, %7 : vector<8x128xf32>
    %9 = vector.extract_strided_slice %5 {offsets = [0, 128], sizes = [8, 128], strides = [1, 1]} : vector<8x512xf32> to vector<8x128xf32>
    %cst_6 = arith.constant 0.000000e+00 : f32
    %10 = vector.broadcast %cst_6 : f32 to vector<8x128xf32>
    %11 = arith.maximumf %9, %10 : vector<8x128xf32>
    %12 = arith.addf %8, %11 : vector<8x128xf32>
    %13 = vector.extract_strided_slice %5 {offsets = [0, 256], sizes = [8, 128], strides = [1, 1]} : vector<8x512xf32> to vector<8x128xf32>
    %cst_7 = arith.constant 0.000000e+00 : f32
    %14 = vector.broadcast %cst_7 : f32 to vector<8x128xf32>
    %15 = arith.maximumf %13, %14 : vector<8x128xf32>
    %16 = arith.addf %12, %15 : vector<8x128xf32>
    %17 = vector.extract_strided_slice %5 {offsets = [0, 384], sizes = [8, 128], strides = [1, 1]} : vector<8x512xf32> to vector<8x128xf32>
    %cst_8 = arith.constant 0.000000e+00 : f32
    %18 = vector.broadcast %cst_8 : f32 to vector<8x128xf32>
    %19 = arith.maximumf %17, %18 : vector<8x128xf32>
    %20 = arith.addf %16, %19 : vector<8x128xf32>
    %21 = vector.extract_strided_slice %20 {offsets = [0, 0], sizes = [8, 64], strides = [1, 1]} : vector<8x128xf32> to vector<8x64xf32>
    %c0_9 = arith.constant 0 : index
    %c0_10 = arith.constant 0 : index
    %22 = vector.load %arg4[%c0_9, %c0_10] : memref<8x64xf32, #tpu.memory_space<vmem>>, vector<8x64xf32>
    tpu.vector_store %arg4[%c0_9, %c0_10], %21 {strides = array<i32>} : memref<8x64xf32, #tpu.memory_space<vmem>>, vector<8x64xf32>,
    return
  }
  func.func @transform_0(%arg0: i32) -> (i32, i32) {
    %c0_i32 = arith.constant 0 : i32
    %c0_i32_0 = arith.constant 0 : i32
    return %arg0, %c0_i32 : i32, i32
  }
  func.func @transform_1(%arg0: i32) -> (i32, i32) {
    %c0_i32 = arith.constant 0 : i32
    %c0_i32_0 = arith.constant 0 : i32
    %c0_i32_1 = arith.constant 0 : i32
    return %c0_i32, %c0_i32_0 : i32, i32
  }
  func.func @transform_2(%arg0: i32) -> (i32, i32) {
    %c0_i32 = arith.constant 0 : i32
    %c0_i32_0 = arith.constant 0 : i32
    %c0_i32_1 = arith.constant 0 : i32
    return %c0_i32, %c0_i32_0 : i32, i32
  }
  func.func @transform_3(%arg0: i32) -> (i32, i32) {
    %c0_i32 = arith.constant 0 : i32
    %c0_i32_0 = arith.constant 0 : i32
    return %arg0, %c0_i32 : i32, i32
  }
}

</mosaic_0001>

<bundles_post_ra>
// kernel: segment2_forward.1
= control target key start
LH: loop header
LB: loop body
LE: loop exit
PB: predicated region body
PF: predicated region fallthrough
CT: control target
= control target key end

     0   :  { %8 = vsyncpa [#allocation3], 0  ;;  %s255_s12 = smov [#allocation2]   ;;  %s291_s0 = inlined_call_operand.vmem [shape: f32[8,32], index: 0, kind: input, shape index: {}]   ;;  %s292_s1 = inlined_call_operand.hbm [shape: f32[32,512], index: 1, kind: input, shape index: {}]   ;;  %s293_s2 = inlined_call_operand.vmem [shape: f32[1,512], index: 2, kind: input, shape index: {}]   ;;  %s294_s3 = inlined_call_operand.vmem [shape: f32[8,64], index: 3, kind: output, shape index: {}]  }
   0x1   :  { %s16_s13 = sshll.u32 %s255_s12, 4  ;;  %s17_s13 = int_to_ptr.vmem [resolvable:$true] %s16_s13 }
   0x2   :  { %s241_s14 = scalar_lea.vmem %s17_s13, 2048  ;;  %p246_p1 = scmp.lt.s32.totalorder %s17_s13, %s17_s13 }
   0x3   :  { %p242_p0 = scmp.ne.s32.totalorder %s17_s13, %s241_s14  ;;  %p247_p2 = scmp.lt.s32.totalorder %s241_s14, %s241_s14 }
   0x5   :  { %p248_p3 = por %p247_p2, %p246_p1 }
   0x7   :  { %p249_p4 = pnand %p248_p3, %p242_p0 }
   0x9   :  { %252 = shalt.err (!%p249_p4)
}
   0xa   :  { %s256_s15 = smov 512   ;;  %s257_s16 = smov 32  }
   0xb   :  { %22 = dma.hbm_to_vmem [thread:$0]  %s292_s1, 2048, %s17_s13, [#allocation3], %s256_s15, %s256_s15, %s257_s16  }
   0xc   :  { %253 = dma.done.wait [#allocation3], 2048  }
   0xd   :  { %254 = vsyncadd [#allocation3], 4294965248  ;;  %v258_v0 = vmov 0.0   ;;  %v42_v1 = vld [vmem:[#allocation2 + $0x68] sm:$0xff]  ;;  %v41_v2 = vld [vmem:[#allocation2 + $0x60] sm:$0xff]  ;;  %vm67_vm0 = vcmask 261120   ;;  %v47_v18 = vlaneseq }
   0xe   :  { %135 = vmatprep.mubr.f32.mxu0 %v258_v0  ;;  %206 = vmatprep.mubr.f32.mxu1 %v258_v0  ;;  %v38_v3 = vld [vmem:[#allocation2 + $0x48] sm:$0xff]  ;;  %v44_v4 = vld [vmem:[#allocation2 + $0x78] sm:$0xff]  ;;  %v37_v5 = vld [vmem:[#allocation2 + $0x40] sm:$0xff]  ;;  %vm220_vm1 = vcmask 523264  }
   0xf   :  { %95 = vmatprep.subr.mxu0 %v42_v1  ;;  %v43_v6 = vld [vmem:[#allocation2 + $0x70] sm:$0xff]  ;;  %166 = vmatprep.subr.mxu1 %v44_v4  ;;  %v34_v7 = vld [vmem:[#allocation2 + $0x28] sm:$0xff]  ;;  %v40_v8 = vld [vmem:[#allocation2 + $0x58] sm:$0xff]  ;;  %v48_v19 = vshrl.u32 %v47_v18, 7 }
  0x10   :  { %96 = vmatpush1.msra.mxu0 %v41_v2  ;;  %167 = vmatpush1.msra.mxu1 %v43_v6  ;;  %v33_v9 = vld [vmem:[#allocation2 + $0x20] sm:$0xff]  ;;  %v39_v10 = vld [vmem:[#allocation2 + $0x50] sm:$0xff]  ;;  %v36_v11 = vld [vmem:[#allocation2 + $0x38] sm:$0xff] }
  0x11   :  { %97 = vmatprep.subr.mxu0 %v38_v3  ;;  %168 = vmatprep.subr.mxu1 %v40_v8  ;;  %v30_v12 = vld [vmem:[#allocation2 + $0x8] sm:$0xff]  ;;  %v35_v13 = vld [vmem:[#allocation2 + $0x30] sm:$0xff]  ;;  %v29_v14 = vld [vmem:[#allocation2] sm:$0xff]  ;;  %v49_v20 = vsub.s32 0, %v48_v19  ;;  %v57_v22 = vsub.s32 2, %v48_v19  ;;  %v53_v23 = vsub.s32 1, %v48_v19 }
  0x12   :  { %98 = vmatpush1.msra.mxu0 %v37_v5  ;;  %169 = vmatpush1.msra.mxu1 %v39_v10  ;;  %v32_v15 = vld [vmem:[#allocation2 + $0x18] sm:$0xff]  ;;  %v28_v16 = vld [vmem:[%s291_s0] sm:$0xff]  ;;  %v31_v17 = vld [vmem:[#allocation2 + $0x10] sm:$0xff]  ;;  %v61_v25 = vsub.s32 3, %v48_v19 }
  0x13   :  { %99 = vmatprep.subr.mxu0 %v34_v7  ;;  %170 = vmatprep.subr.mxu1 %v36_v11  ;;  %v45_v21 = vld [vmem:[%s293_s2] sm:$0xf] }
  0x14   :  { %100 = vmatpush1.msra.mxu0 %v33_v9  ;;  %171 = vmatpush1.msra.mxu1 %v35_v13  ;;  %v50_v24 = vrot.slane %v45_v21, %v49_v20  ;;  %v58_v26 = vrot.slane %v45_v21, %v57_v22  ;;  %v54_v27 = vrot.slane %v45_v21, %v53_v23 }
  0x15   :  { %101 = vmatprep.subr.mxu0 %v30_v12  ;;  %172 = vmatprep.subr.mxu1 %v32_v15  ;;  %v62_v31 = vrot.slane %v45_v21, %v61_v25 }
  0x16   :  { %102 = vmatpush1.msra.mxu0 %v29_v14  ;;  %173 = vmatpush1.msra.mxu1 %v31_v17 }
  0x17   :  { %227 = vmatmul.mubr.msk.f32.vlgmr.msra.gmra.mxu0 %vm67_vm0, %v28_v16  ;;  %228 = vmatmul.mubr.msk.f32.vlgmr.msra.gmra.mxu1 %vm67_vm0, %v28_v16 }
  0xd7   :  { %v137_v28 = vpop.f32.mrf.mxu0  ;;  %v208_v30 = vpop.f32.mrf.mxu1 }
  0xd8   :  { %v138_v29 = vadd.f32 %v137_v28, %v50_v24  ;;  %v209_v33 = vadd.f32 %v208_v30, %v58_v26 }
  0xd9   :  { %v139_v32 = vpop.f32.mrf.mxu0  ;;  %v210_v35 = vpop.f32.mrf.mxu1 }
  0xda   :  { %v140_v34 = vadd.f32 %v139_v32, %v54_v27  ;;  %v213_v36 = vmax.f32 %v138_v29, 0.0  ;;  %v216_v38 = vmax.f32 %v209_v33, 0.0  ;;  %v211_v39 = vadd.f32 %v210_v35, %v62_v31 }
  0xdc   :  { %v214_v37 = vmax.f32 %v140_v34, 0.0  ;;  %v218_v42 = vmax.f32 %v211_v39, 0.0 }
  0xde   :  { %v215_v40 = vadd.f32 %v214_v37, %v213_v36 }
  0xe0   :  { %v217_v41 = vadd.f32 %v216_v38, %v215_v40 }
  0xe2   :  { %v219_v43 = vadd.f32 %v218_v42, %v217_v41 }
  0xe4   :  { %221 = vst.msk [vmem:[%s294_s3] sm:$0xff] %vm220_vm1, %v219_v43 }
  0xe5   :  { %226 = vsyncpa [#allocation3], 1 }

</bundles_post_ra>
